<compile_context>
chip_gen: v7x
topology: tpu7x:2x2x1
jax: 0.10.0
libtpu: 0.0.40
codegen_flags: <defaults>
</compile_context>

<pallas_src>
from typing import NamedTuple

import jax
import jax.numpy as jnp
from jax.experimental import pallas as pl
from jax.experimental.pallas import tpu as pltpu


def _round_up(x, m):
    return ((x + m - 1) // m) * m


# ----------------------------------------------------------------------------
# Parameter preparation (run once at model-load time).
# ----------------------------------------------------------------------------
class SAEParams(NamedTuple):
    w_enc: jax.Array      # (Dm_p, Ds_p) compute dtype (bf16)
    w_dec: jax.Array      # (Ds_p, Dm_p) compute dtype (bf16)
    bias_thr: jax.Array   # (2, Ds_p) f32: row 0 = b_enc, row 1 = threshold (+inf in padding)
    b_dec: jax.Array      # (1, Dm_p) f32
    d_model: int
    d_sae: int


def prepare_jumprelu_sae_params(w_enc, b_enc, threshold, w_dec, b_dec, *,
                                compute_dtype=jnp.bfloat16):
    """Cast + lane-pad the SAE parameters once (hoisted out of the per-call path)."""
    d_model, d_sae = w_enc.shape
    assert w_dec.shape == (d_sae, d_model)
    Dm_p = _round_up(d_model, 128)
    Ds_p = _round_up(d_sae, 128)

    w_enc_c = w_enc.astype(compute_dtype)
    w_dec_c = w_dec.astype(compute_dtype)
    if (Dm_p, Ds_p) != (d_model, d_sae):
        w_enc_c = jnp.pad(w_enc_c, ((0, Dm_p - d_model), (0, Ds_p - d_sae)))
        w_dec_c = jnp.pad(w_dec_c, ((0, Ds_p - d_sae), (0, Dm_p - d_model)))

    b_enc_p = b_enc.astype(jnp.float32)
    thr_p = threshold.astype(jnp.float32)
    b_dec_p = b_dec.astype(jnp.float32)
    if Ds_p != d_sae:
        b_enc_p = jnp.pad(b_enc_p, (0, Ds_p - d_sae))
        # padded features must never fire
        thr_p = jnp.pad(thr_p, (0, Ds_p - d_sae), constant_values=jnp.inf)
    if Dm_p != d_model:
        b_dec_p = jnp.pad(b_dec_p, (0, Dm_p - d_model))

    bias_thr = jnp.stack([b_enc_p, thr_p], axis=0)          # (2, Ds_p)
    return SAEParams(w_enc=w_enc_c, w_dec=w_dec_c, bias_thr=bias_thr,
                     b_dec=b_dec_p.reshape(1, Dm_p),
                     d_model=d_model, d_sae=d_sae)


# ----------------------------------------------------------------------------
# Kernels.
# ----------------------------------------------------------------------------
def _sae_step(x_ref, w_enc_ref, bthr_ref, w_dec_ref, k):
    """Partial decode for this d_sae slab: relu-gated encode then decode matmul."""
    bt = bthr_ref[k]                                          # (2, tk) f32, VMEM-resident
    pre = jnp.dot(x_ref[...], w_enc_ref[...],
                  preferred_element_type=jnp.float32) + bt[0:1, :]
    acts = jnp.where(pre > bt[1:2, :], jnp.maximum(pre, 0.0), 0.0)
    return jnp.dot(acts.astype(w_dec_ref.dtype), w_dec_ref[...],
                   preferred_element_type=jnp.float32)


def _sae_kernel_f32out(x_ref, w_enc_ref, bthr_ref, w_dec_ref, b_dec_ref, o_ref):
    """f32 output: accumulate directly into the resident output block (no scratch)."""
    k = pl.program_id(1)
    partial = _sae_step(x_ref, w_enc_ref, bthr_ref, w_dec_ref, k)

    @pl.when(k == 0)
    def _():
        o_ref[...] = partial + b_dec_ref[...]

    @pl.when(k > 0)
    def _():
        o_ref[...] = o_ref[...] + partial


def _sae_kernel_scratch(x_ref, w_enc_ref, bthr_ref, w_dec_ref, b_dec_ref, o_ref,
                        acc_ref):
    """Non-f32 output: accumulate in an f32 VMEM scratch, cast on the last k step."""
    k = pl.program_id(1)
    partial = _sae_step(x_ref, w_enc_ref, bthr_ref, w_dec_ref, k)

    @pl.when(k == 0)
    def _():
        acc_ref[...] = partial

    @pl.when(k > 0)
    def _():
        acc_ref[...] = acc_ref[...] + partial

    @pl.when(k == pl.num_programs(1) - 1)
    def _():
        o_ref[...] = (acc_ref[...] + b_dec_ref[...]).astype(o_ref.dtype)


# ----------------------------------------------------------------------------
# Tile selection (generation-aware via VMEM capacity).
# ----------------------------------------------------------------------------
def _vmem_estimate(tb, tk, Dm_p, Ds_p, in_bytes, out_bytes, f32_out, wbuf=2):
    x_tile = 2 * tb * Dm_p * in_bytes                      # double-buffered x tile
    w_slabs = wbuf * 2 * Dm_p * tk * in_bytes              # W_enc + W_dec slabs
    out_tile = 2 * tb * Dm_p * out_bytes                   # double-buffered output tile
    resident = 2 * (2 * Ds_p * 4 + Dm_p * 4)               # bias/threshold + b_dec
    scratch = 0 if f32_out else tb * Dm_p * 4
    return x_tile + w_slabs + out_tile + resident + scratch


def _choose_tiles(B, Dm_p, Ds_p, in_bytes, out_bytes, f32_out, vmem_cap,
                  tb_req=None, tk_req=None, wbuf=2):
    budget = int(0.70 * vmem_cap)
    B16 = _round_up(max(B, 1), 16)

    if tb_req is not None:
        tb_cands = [max(16, min(_round_up(int(tb_req), 16), B16))]
    else:
        cands = [1024, 768, 512, 384, 256, 192, 128, 96, 64, 48, 32, 16]
        cands = [min(c, B16) for c in cands]
        if B16 >= 32:
            # keep >= 2 batch tiles so both v7x TensorCores get work
            half = _round_up(B16 // 2, 16)
            cands = [min(c, half) for c in cands]
        tb_cands = sorted(set(cands), reverse=True)

    if tk_req is not None:
        tk_cands = [max(128, min(_round_up(int(tk_req), 128), Ds_p))]
    else:
        tk_cands = [2048, 1024, 512, 256, 128]
        if Ds_p <= 4096:
            tk_cands.append(Ds_p)
        tk_cands = sorted({min(c, Ds_p) for c in tk_cands}, reverse=True)
    tk_cands = [c for c in tk_cands if Ds_p % c == 0] or [128]

    # First pass prefers tk >= 512 (amortizes per-step overhead / acc RMW on v5e);
    # tb descending is tried first because tb sets arithmetic intensity.
    prefer_tk = [c for c in tk_cands if c >= 512] or tk_cands
    for cand_list in (prefer_tk, tk_cands):
        for tb in tb_cands:
            for tk in cand_list:
                est = _vmem_estimate(tb, tk, Dm_p, Ds_p, in_bytes, out_bytes,
                                     f32_out, wbuf)
                if est <= budget:
                    return tb, tk, est
    tb, tk = tb_cands[-1], tk_cands[-1]
    return tb, tk, _vmem_estimate(tb, tk, Dm_p, Ds_p, in_bytes, out_bytes,
                                  f32_out, wbuf)


# ----------------------------------------------------------------------------
# Forward wrapper.
# ----------------------------------------------------------------------------
def jumprelu_sae_forward(x, params: SAEParams, *, tb=None, tk=None,
                         weight_buffers=None):
    """recon = decode(encode(x)).  x: (B, d_model); returns (B, d_model) in x.dtype."""
    B, d_model = x.shape
    assert d_model == params.d_model, (d_model, params.d_model)
    Dm_p, Ds_p = params.w_enc.shape
    compute_dtype = params.w_enc.dtype
    out_dtype = x.dtype
    f32_out = jnp.dtype(out_dtype) == jnp.dtype(jnp.float32)

    in_bytes = jnp.dtype(compute_dtype).itemsize
    out_bytes = jnp.dtype(out_dtype).itemsize
    try:
        vmem_cap = int(pltpu.get_tpu_info().vmem_capacity_bytes)
    except Exception:
        vmem_cap = 64 * 1024 * 1024            # conservative (v7x per-TC)

    wbuf = int(weight_buffers) if weight_buffers else 2
    tb, tk, est = _choose_tiles(B, Dm_p, Ds_p, in_bytes, out_bytes, f32_out,
                                vmem_cap, tb, tk, wbuf)
    B_p = _round_up(B, tb)
    n_k = Ds_p // tk
    grid = (B_p // tb, n_k)

    # Per-call input prep: only x is cast/padded (weights were prepared once).
    x_c = x.astype(compute_dtype)
    if (B_p, Dm_p) != (B, d_model):
        x_c = jnp.pad(x_c, ((0, B_p - B), (0, Dm_p - d_model)))
    # Tiny reshape so bias/threshold stay VMEM-resident, indexed by k in-kernel.
    bthr = params.bias_thr.reshape(2, n_k, tk).transpose(1, 0, 2)   # (n_k, 2, tk)

    def _weight_spec(shape, index_map):
        if weight_buffers is not None and int(weight_buffers) != 2:
            return pl.BlockSpec(shape, index_map,
                                pipeline_mode=pl.Buffered(int(weight_buffers)))
        return pl.BlockSpec(shape, index_map)

    in_specs = [
        pl.BlockSpec((tb, Dm_p), lambda i, k: (i, 0)),        # x batch tile
        _weight_spec((Dm_p, tk), lambda i, k: (0, k)),        # W_enc slab
        pl.BlockSpec((n_k, 2, tk), lambda i, k: (0, 0, 0)),   # b_enc/threshold (resident)
        _weight_spec((tk, Dm_p), lambda i, k: (k, 0)),        # W_dec slab
        pl.BlockSpec((1, Dm_p), lambda i, k: (0, 0)),         # b_dec (resident)
    ]
    out_specs = pl.BlockSpec((tb, Dm_p), lambda i, k: (i, 0))

    if f32_out:
        kernel = _sae_kernel_f32out
        scratch = []
    else:
        kernel = _sae_kernel_scratch
        scratch = [pltpu.VMEM((tb, Dm_p), jnp.float32)]

    vmem_limit = int(min(max(32 * 1024 * 1024, int(1.25 * est)),
                         (9 * vmem_cap) // 10))

    n_batch_tiles = B_p // tb
    cost = pl.CostEstimate(
        flops=4 * B_p * Dm_p * Ds_p,                          # encode + decode matmuls
        transcendentals=0,
        bytes_accessed=int(
            B_p * Dm_p * in_bytes                             # x (read once)
            + n_batch_tiles * (params.w_enc.size + params.w_dec.size) * in_bytes
            + (params.bias_thr.size + params.b_dec.size) * 4
            + B_p * Dm_p * out_bytes))

    out = pl.pallas_call(
        kernel,
        out_shape=jax.ShapeDtypeStruct((B_p, Dm_p), out_dtype),
        grid_spec=pltpu.PrefetchScalarGridSpec(
            num_scalar_prefetch=0,
            grid=grid,
            in_specs=in_specs,
            out_specs=out_specs,
            scratch_shapes=scratch),
        compiler_params=pltpu.CompilerParams(
            dimension_semantics=("parallel", "arbitrary"),
            vmem_limit_bytes=vmem_limit),
        cost_estimate=cost,
    )(x_c, params.w_enc, bthr, params.w_dec, params.b_dec)

    return out[:B, :d_model]


# ----------------------------------------------------------------------------
# Reference + tests.
# ----------------------------------------------------------------------------
def _ref_forward(x, w_enc, b_enc, threshold, w_dec, b_dec,
                 compute_dtype=jnp.bfloat16):
    pre = jnp.dot(x.astype(compute_dtype), w_enc.astype(compute_dtype),
                  preferred_element_type=jnp.float32) + b_enc
    acts = jnp.where(pre > threshold, jnp.maximum(pre, 0.0), 0.0)
    return jnp.dot(acts.astype(compute_dtype), w_dec.astype(compute_dtype),
                   preferred_element_type=jnp.float32) + b_dec


def _make_params(key, B, d_model, d_sae):
    kx, ke, kd, kt, kbe, kbd = jax.random.split(key, 6)
    x = jax.random.normal(kx, (B, d_model), dtype=jnp.float32)
    w_enc = jax.random.normal(ke, (d_model, d_sae), dtype=jnp.float32) * 0.1
    w_dec = jax.random.normal(kd, (d_sae, d_model), dtype=jnp.float32) * 0.1
    threshold = jax.random.uniform(kt, (d_sae,), dtype=jnp.float32) * 0.05
    b_enc = jax.random.normal(kbe, (d_sae,), dtype=jnp.float32) * 0.01
    b_dec = jax.random.normal(kbd, (d_model,), dtype=jnp.float32) * 0.01
    return x, w_enc, b_enc, threshold, w_dec, b_dec


if __name__ == "__main__":
    key = jax.random.PRNGKey(0)
    k1, k2, k3 = jax.random.split(key, 3)

    # 1) Lane-dense shapes, f32 output (accumulate-into-output path). tk=128
    #    forces >= 2 d_sae steps so the k>0 accumulation branch is exercised.
    B, d_model, d_sae = 64, 128, 256
    x, w_enc, b_enc, thr, w_dec, b_dec = _make_params(k1, B, d_model, d_sae)
    params = prepare_jumprelu_sae_params(w_enc, b_enc, thr, w_dec, b_dec)
    recon = jax.block_until_ready(jumprelu_sae_forward(x, params, tk=128))
    ref = _ref_forward(x, w_enc, b_enc, thr, w_dec, b_dec)
    assert recon.shape == (B, d_model)
    assert jnp.allclose(recon, ref, atol=5e-2, rtol=5e-2), \
        float(jnp.max(jnp.abs(recon - ref)))

    # 2) Odd shapes: exercises the one-time padding in prepare + per-call x pad.
    B, d_model, d_sae = 48, 96, 200
    x, w_enc, b_enc, thr, w_dec, b_dec = _make_params(k2, B, d_model, d_sae)
    params = prepare_jumprelu_sae_params(w_enc, b_enc, thr, w_dec, b_dec)
    recon2 = jax.block_until_ready(jumprelu_sae_forward(x, params))
    ref2 = _ref_forward(x, w_enc, b_enc, thr, w_dec, b_dec)
    assert recon2.shape == (B, d_model)
    assert jnp.allclose(recon2, ref2, atol=5e-2, rtol=5e-2), \
        float(jnp.max(jnp.abs(recon2 - ref2)))

    # 3) bf16 activations -> bf16 output: exercises the f32 scratch-accumulator path.
    B, d_model, d_sae = 32, 128, 256
    x, w_enc, b_enc, thr, w_dec, b_dec = _make_params(k3, B, d_model, d_sae)
    params = prepare_jumprelu_sae_params(w_enc, b_enc, thr, w_dec, b_dec)
    recon3 = jax.block_until_ready(
        jumprelu_sae_forward(x.astype(jnp.bfloat16), params, tk=128))
    ref3 = _ref_forward(x, w_enc, b_enc, thr, w_dec, b_dec)
    assert recon3.shape == (B, d_model)
    assert jnp.allclose(recon3.astype(jnp.float32), ref3, atol=1e-1, rtol=1e-1), \
        float(jnp.max(jnp.abs(recon3.astype(jnp.float32) - ref3)))

    print("KERNEL_OK")
</pallas_src>

<mosaic_0001>
module attributes {stable_mosaic.version = 11 : i64} {
  func.func @_sae_kernel_f32out(%arg0: i32, %arg1: i32, %arg2: memref<32x128xbf16, #tpu.memory_space<vmem>>, %arg3: memref<128x128xbf16, #tpu.memory_space<vmem>>, %arg4: memref<2x2x128xf32, #tpu.memory_space<vmem>>, %arg5: memref<128x128xbf16, #tpu.memory_space<vmem>>, %arg6: memref<1x128xf32, #tpu.memory_space<vmem>>, %arg7: memref<32x128xf32, #tpu.memory_space<vmem>>) attributes {dimension_semantics = [#tpu.dimension_semantics<parallel>, #tpu.dimension_semantics<arbitrary>], iteration_bounds = array<i64: 2, 2>, scalar_prefetch = 0 : i64, scratch_operands = 0 : i64, tpu.core_type = #tpu.core_type<tc>, window_params = [{transform_indices = @transform_0, window_bounds = array<i64: 32, 128>}, {transform_indices = @transform_1, window_bounds = array<i64: 128, 128>}, {pipeline_mode = #tpu.pipeline_mode<synchronous>, transform_indices = @transform_2, window_bounds = array<i64: 2, 2, 128>}, {transform_indices = @transform_3, window_bounds = array<i64: 128, 128>}, {pipeline_mode = #tpu.pipeline_mode<synchronous>, transform_indices = @transform_4, window_bounds = array<i64: 1, 128>}, {transform_indices = @transform_5, window_bounds = array<i64: 32, 128>}]} {
    %0 = arith.index_cast %arg1 : i32 to index
    %c0 = arith.constant 0 : index
    %c0_0 = arith.constant 0 : index
    %1 = vector.load %arg4[%0, %c0, %c0_0] : memref<2x2x128xf32, #tpu.memory_space<vmem>>, vector<1x2x128xf32>
    %2 = vector.shape_cast %1 : vector<1x2x128xf32> to vector<2x128xf32>
    %c0_1 = arith.constant 0 : index
    %c0_2 = arith.constant 0 : index
    %3 = vector.load %arg2[%c0_1, %c0_2] : memref<32x128xbf16, #tpu.memory_space<vmem>>, vector<32x128xbf16>
    %c0_3 = arith.constant 0 : index
    %c0_4 = arith.constant 0 : index
    %4 = vector.load %arg3[%c0_3, %c0_4] : memref<128x128xbf16, #tpu.memory_space<vmem>>, vector<128x128xbf16>
    %cst = arith.constant dense<0.000000e+00> : vector<32x128xf32>
    %5 = tpu.matmul %3, %4, %cst {dimension_numbers = #tpu.dot_dimension_numbers<[1], [0], [0], [1], [0, 0, 1, 1], [], []>} : vector<32x128xbf16>, vector<128x128xbf16>, vector<32x128xf32> -> vector<32x128xf32>
    %6 = vector.extract_strided_slice %2 {offsets = [0, 0], sizes = [1, 128], strides = [1, 1]} : vector<2x128xf32> to vector<1x128xf32>
    %7 = vector.broadcast %6 : vector<1x128xf32> to vector<32x128xf32>
    %8 = arith.addf %5, %7 : vector<32x128xf32>
    %9 = vector.extract_strided_slice %2 {offsets = [1, 0], sizes = [1, 128], strides = [1, 1]} : vector<2x128xf32> to vector<1x128xf32>
    %10 = vector.broadcast %9 : vector<1x128xf32> to vector<32x128xf32>
    %11 = arith.cmpf ogt, %8, %10 : vector<32x128xf32>
    %cst_5 = arith.constant 0.000000e+00 : f32
    %12 = vector.broadcast %cst_5 : f32 to vector<32x128xf32>
    %13 = arith.maximumf %8, %12 : vector<32x128xf32>
    %cst_6 = arith.constant 0.000000e+00 : f32
    %14 = vector.broadcast %cst_6 : f32 to vector<32x128xf32>
    %15 = arith.select %11, %13, %14 : vector<32x128xi1>, vector<32x128xf32>
    %16 = arith.truncf %15 : vector<32x128xf32> to vector<32x128xbf16>
    %c0_7 = arith.constant 0 : index
    %c0_8 = arith.constant 0 : index
    %17 = vector.load %arg5[%c0_7, %c0_8] : memref<128x128xbf16, #tpu.memory_space<vmem>>, vector<128x128xbf16>
    %cst_9 = arith.constant dense<0.000000e+00> : vector<32x128xf32>
    %18 = tpu.matmul %16, %17, %cst_9 {dimension_numbers = #tpu.dot_dimension_numbers<[1], [0], [0], [1], [0, 0, 1, 1], [], []>} : vector<32x128xbf16>, vector<128x128xbf16>, vector<32x128xf32> -> vector<32x128xf32>
    %c0_i32 = arith.constant 0 : i32
    %19 = arith.cmpi eq, %arg1, %c0_i32 : i32
    %20 = arith.extui %19 : i1 to i32
    %c0_i32_10 = arith.constant 0 : i32
    %21 = arith.cmpi ne, %20, %c0_i32_10 : i32
    scf.if %21 {
      %c0_13 = arith.constant 0 : index
      %c0_14 = arith.constant 0 : index
      %25 = vector.load %arg6[%c0_13, %c0_14] : memref<1x128xf32, #tpu.memory_space<vmem>>, vector<1x128xf32>
      %26 = vector.broadcast %25 : vector<1x128xf32> to vector<32x128xf32>
      %27 = arith.addf %18, %26 : vector<32x128xf32>
      %c0_15 = arith.constant 0 : index
      %c0_16 = arith.constant 0 : index
      %28 = vector.load %arg7[%c0_15, %c0_16] : memref<32x128xf32, #tpu.memory_space<vmem>>, vector<32x128xf32>
      tpu.vector_store %arg7[%c0_15, %c0_16], %27 {strides = array<i32>} : memref<32x128xf32, #tpu.memory_space<vmem>>, vector<32x128xf32>,
    } else {
    }
    %c0_i32_11 = arith.constant 0 : i32
    %22 = arith.cmpi sgt, %arg1, %c0_i32_11 : i32
    %23 = arith.extui %22 : i1 to i32
    %c0_i32_12 = arith.constant 0 : i32
    %24 = arith.cmpi ne, %23, %c0_i32_12 : i32
    scf.if %24 {
      %c0_13 = arith.constant 0 : index
      %c0_14 = arith.constant 0 : index
      %25 = vector.load %arg7[%c0_13, %c0_14] : memref<32x128xf32, #tpu.memory_space<vmem>>, vector<32x128xf32>
      %26 = arith.addf %25, %18 : vector<32x128xf32>
      %c0_15 = arith.constant 0 : index
      %c0_16 = arith.constant 0 : index
      %27 = vector.load %arg7[%c0_15, %c0_16] : memref<32x128xf32, #tpu.memory_space<vmem>>, vector<32x128xf32>
      tpu.vector_store %arg7[%c0_15, %c0_16], %26 {strides = array<i32>} : memref<32x128xf32, #tpu.memory_space<vmem>>, vector<32x128xf32>,
    } else {
    }
    return
  }
  func.func @transform_0(%arg0: i32, %arg1: i32) -> (i32, i32) {
    %c0_i32 = arith.constant 0 : i32
    %c0_i32_0 = arith.constant 0 : i32
    return %arg0, %c0_i32 : i32, i32
  }
  func.func @transform_1(%arg0: i32, %arg1: i32) -> (i32, i32) {
    %c0_i32 = arith.constant 0 : i32
    %c0_i32_0 = arith.constant 0 : i32
    return %c0_i32, %arg1 : i32, i32
  }
  func.func @transform_2(%arg0: i32, %arg1: i32) -> (i32, i32, i32) {
    %c0_i32 = arith.constant 0 : i32
    %c0_i32_0 = arith.constant 0 : i32
    %c0_i32_1 = arith.constant 0 : i32
    %c0_i32_2 = arith.constant 0 : i32
    return %c0_i32, %c0_i32_0, %c0_i32_1 : i32, i32, i32
  }
  func.func @transform_3(%arg0: i32, %arg1: i32) -> (i32, i32) {
    %c0_i32 = arith.constant 0 : i32
    %c0_i32_0 = arith.constant 0 : i32
    return %arg1, %c0_i32 : i32, i32
  }
  func.func @transform_4(%arg0: i32, %arg1: i32) -> (i32, i32) {
    %c0_i32 = arith.constant 0 : i32
    %c0_i32_0 = arith.constant 0 : i32
    %c0_i32_1 = arith.constant 0 : i32
    return %c0_i32, %c0_i32_0 : i32, i32
  }
  func.func @transform_5(%arg0: i32, %arg1: i32) -> (i32, i32) {
    %c0_i32 = arith.constant 0 : i32
    %c0_i32_0 = arith.constant 0 : i32
    return %arg0, %c0_i32 : i32, i32
  }
}

</mosaic_0001>

<bundles_post_ra>
// kernel: tpu_custom_call.1
= control target key start
LH: loop header
LB: loop body
LE: loop exit
PB: predicated region body
PF: predicated region fallthrough
CT: control target
= control target key end

     0   :  { %s1694_s0 = inlined_call_operand.hbm [shape: bf16[64,128], index: 0, kind: input, shape index: {}]   ;;  %s1695_s1 = inlined_call_operand.hbm [shape: bf16[128,256], index: 1, kind: input, shape index: {}]   ;;  %s1696_s2 = inlined_call_operand.vmem [shape: f32[2,2,128], index: 2, kind: input, shape index: {}]   ;;  %s1697_s3 = inlined_call_operand.hbm [shape: bf16[256,128], index: 3, kind: input, shape index: {}]   ;;  %s1698_s4 = inlined_call_operand.vmem [shape: f32[1,128], index: 4, kind: input, shape index: {}]   ;;  %s1699_s5 = inlined_call_operand.hbm [shape: f32[64,128], index: 5, kind: output, shape index: {}]  }
   0x1   :  { %1716 = sst [smem:[#allocation20_spill]] %s1695_s1 }
   0x2   :  { %1717 = sst [smem:[#allocation21_spill]] %s1698_s4 }
   0x3   :  { %1718 = sst [smem:[#allocation22_spill]] %s1699_s5 }
   0x4   :  { %10 = vsyncpa [#allocation3], 0 }
   0x5   :  { %12 = vsyncpa [#allocation3 + $0x1], 0 }
   0x6   :  { %13 = vsyncpa [#allocation6], 0 }
   0x7   :  { %15 = vsyncpa [#allocation6 + $0x1], 0 }
   0x8   :  { %16 = vsyncpa [#allocation4], 0 }
   0x9   :  { %18 = vsyncpa [#allocation4 + $0x1], 0  ;;  %s1285_s18 = smov 0   ;;  %s1287_s19 = smov 0  }
   0xa   :  { %s1289_s20 = smov 0   ;;  %s1291_s21 = smov 0  }
   0xb   :  { %s1293_s22 = smov 0   ;;  %s1295_s23 = smov 0  }
   0xc   :  { %s1297_s24 = smov 0   ;;  %s1299_s25 = smov 0  }
   0xd   :  { %s1301_s26 = smov 0   ;;  %s1303_s27 = smov 0  }
   0xe   :  { %s1305_s28 = smov 0  }
   0xf LB: > { %1719 = sst [smem:[#allocation12_spill]] %s1212_s20  ;;  %s33_s29 = sadd.s32 1, %s1236_s26  ;;  %s1244_s28 = sphi %s1305_s28, %s24_s28   ;;  %s1240_s27 = sphi %s1303_s27, %s1766_s27   ;;  %s1236_s26 = sphi %s1301_s26, %s1765_s26   ;;  %s1232_s25 = sphi %s1299_s25, %s1757_s25   ;;  %s1228_s24 = sphi %s1297_s24, %s1764_s24   ;;  %s1224_s23 = sphi %s1295_s23, %s1756_s23   ;;  %s1220_s22 = sphi %s1293_s22, %s1763_s22   ;;  %s1216_s21 = sphi %s1291_s21, %s1762_s21   ;;  %s1212_s20 = sphi %s1289_s20, %s1754_s20   ;;  %s1208_s19 = sphi %s1287_s19, %s1761_s19   ;;  %s1204_s18 = sphi %s1285_s18, %s1760_s18  }
  0x10   : > { %1720 = sst [smem:[#allocation13_spill]] %s1224_s23  ;;  %p1702_p0 = scmp.eq.s32.totalorder %s1244_s28, 0 }
  0x11   : > { %1721 = sst [smem:[#allocation14_spill]] %s1232_s25  ;;  %p1342_p1 = scmp.ge.s32.totalorder %s33_s29, 2 }
  0x12   : > { %1722 = sst [smem:[#allocation15_spill]] %s1240_s27  ;;  %s69_s6 = sadd.s32 1, %s1212_s20 }
  0x13   : > { %p76_p2 = scmp.ne.s32.totalorder %s1212_s20, %s1208_s19  ;;  %s1768_s29 = smov (%p1342_p1, %s33_s29), 0 }
  0x14   : > { %1724 = sst [smem:[#allocation16_spill]] %s1768_s29  ;;  %s66_s7 = ssub.s32 %s1236_s26, %s1768_s29 }
  0x15   : > { %p78_p4 = por %p76_p2, %p1702_p0  ;;  %p1701_p5 = scmp.lt.s32.totalorder %s1244_s28, 4 }
  0x16   : > { %p67_p6 = scmp.eq.s32.totalorder %s66_s7, 0  ;;  %s227_s8 = sand.u32 1, %s1244_s28  }
  0x17   : > { %s229_s10 = sand.u32 1, %s1212_s20   ;;  %s788_s12 = sshll.u32 %s1236_s26, 6 }
  0x18   : > { %s1362_s9 = scalar_select %p67_p6, %s1212_s20, %s69_s6  }
  0x19   : > { %s1365_s11 = sshll.u32 %s229_s10, 6  ;;  %s1726_s1 = sld [smem:[#allocation20_spill]] }
  0x1a   : > { %1725 = sst [smem:[#allocation17_spill]] %s1362_s9  ;;  %s231_s16 = scalar_lea.vmem [#allocation5], %s1365_s11 }
  0x1b   : > { %s237_s17 = sshll.u32 %s231_s16, 4  ;;  %p1376_p7 = pnand %p1701_p5, %p78_p4  ;;  %s1380_s17 = int_to_ptr.vmem [resolvable:$true] %s237_s17 }
  0x1c   : > { %s1383_s7 = scalar_lea.sflag [#allocation6], %s227_s8 }
  0x1d   : > { %p1705_p10 = pneg %p1376_p7 }
  0x1f   : > { %s1371_s15 = scalar_lea.hbm %s1726_s1, %s788_s12  ;;  %s1033_s14 = scalar_lea.hbm %s1726_s1, 2048 }
  0x20   : > { %s1028_s10 = scalar_lea.hbm %s1371_s15, 1024  ;;  %p1034_p13 = scmp.lt.u32.totalorder %s1371_s15, %s1726_s1 }
  0x21   : > { %p1029_p9 = scmp.ne.s32.totalorder %s1371_s15, %s1028_s10  ;;  %p1035_p2 = scmp.lt.u32.totalorder %s1033_s14, %s1028_s10 }
  0x22   : > { %p1037_p6 = scmp.lt.u32.totalorder %s1028_s10, %s1371_s15 }
  0x23   : > { %p1031_p11 = pnand %p1705_p10, %p1029_p9  ;;  %p1036_p4 = por %p1035_p2, %p1034_p13 }
  0x25   : > { %p1032_p12 = pneg %p1031_p11  ;;  %p1038_p5 = por %p1037_p6, %p1036_p4 }
  0x27   : > { %p1039_p3 = pnand %p1038_p5, %p1032_p12 }
  0x29   : > { %1042 = shalt.err (!%p1039_p3)
}
  0x2a   : > { %s1043_s8 = scalar_lea.vmem %s1380_s17, 1024  ;;  %s1246_s12 = smov [#allocation5]  }
  0x2b   : > { %p1044_p9 = scmp.ne.s32.totalorder %s1380_s17, %s1043_s8  ;;  %s1048_s13 = sshll.u32 %s1246_s12, 4  ;;  %s1049_s13 = int_to_ptr.vmem [resolvable:$false] %s1048_s13 }
  0x2c   : > { %s1050_s29 = scalar_lea.vmem %s1049_s13, 2048  ;;  %p1051_p8 = scmp.lt.s32.totalorder %s1380_s17, %s1049_s13 }
  0x2d   : > { %p1046_p11 = pnand %p1044_p9, %p1705_p10  ;;  %p1052_p13 = scmp.lt.s32.totalorder %s1050_s29, %s1043_s8 }
  0x2f   : > { %p1047_p0 = pneg %p1046_p11  ;;  %p1053_p2 = por %p1052_p13, %p1051_p8 }
  0x31   : > { %p1054_p4 = pnand %p1053_p2, %p1047_p0 }
  0x33   : > { %1057 = shalt.err (!%p1054_p4)
}
  0x34   : > { %s1247_s10 = smov 128   ;;  %s1703_s14 = smov 64  }
  0x35   : > { %s1706_s16 = smov 4   ;;  %p266_p0 = scmp.lt.s32.totalorder %s1244_s28, 5 }
  0x36   : > { %907 = dma.hbm_to_vmem [thread:$0]  (!%p1376_p7), %s1371_s15, 1024, %s1380_s17, %s1383_s7, %s1247_s10, %s1703_s14, %s1706_s16  }
  0x37   : > { %p1728_p3 = scmp.ge.s32.totalorder %s1244_s28, 1  ;;  %s1421_s12 = sadd.s32 4294967295, %s1244_s28  }
  0x38   : > { %s781_s13 = sadd.s32 4294967294, %s1244_s28   ;;  %s36_s29 = sadd.s32 1, %s1240_s27 }
  0x39   : > { %p1416_p5 = pnand %p1728_p3, %p266_p0  ;;  %s43_s1 = sadd.s32 1, %s1224_s23 }
  0x3a   : > { %s1770_s29 = smov (!%p1342_p1, %s36_s29), %s1240_s27  ;;  %p50_p8 = scmp.ne.s32.totalorder %s1224_s23, %s1220_s22 }
  0x3b   : > { %s1729_s8 = scalar_select %p1416_p5, 1, 0 }
  0x3c   : > { %p56_p12 = scmp.ne.s32.totalorder %s1220_s22, %s1216_s21  ;;  %p38_p6 = scmp.ge.s32.totalorder %s1770_s29, 2 }
  0x3d   : > { %p57_p9 = scmp.eq.s32.totalorder %s1421_s12, 0  ;;  %p1730_p11 = scmp.eq.s32.totalorder %s1244_s28, 0 }
  0x3e   : > { %p174_p2 = scmp.eq.s32.totalorder %s1421_s12, 3  ;;  %s1772_s29 = smov (%p38_p6, %s1770_s29), 0 }
  0x3f   : > { %p1436_p13 = por %p1730_p11, %p50_p8  ;;  %1732 = sst [smem:[#allocation18_spill]] %s1772_s29 }
  0x40   : > { %p1446_p1 = por %p57_p9, %p56_p12  ;;  %p1734_p4 = scmp.ne.s32.totalorder %s1208_s19, %s1204_s18 }
  0x41   : > { %s40_s10 = ssub.s32 %s1240_s27, %s1772_s29  ;;  %p1459_p3 = por %p174_p2, %p50_p8 }
  0x42   : > { %s1733_s30 = scalar_select %p1446_p1, 1, 0 }
  0x43   : > { %p1453_p0 = por %p1734_p4, %p57_p9  ;;  %p41_p11 = scmp.eq.s32.totalorder %s40_s10, 0 }
  0x44   : > { %s1736_s14 = scalar_select %p1459_p3, 1, 0 }
  0x45   : > { %s1735_s17 = scalar_select %p1453_p0, 1, 0 }
  0x46   : > { %p180_p10 = scmp.eq.s32.totalorder %s781_s13, 3  ;;  %s206_s16 = sand.u32 1, %s1224_s23  }
  0x47   : > { %s830_s9 = sshll.u32 %s1240_s27, 8  ;;  %s784_s18 = sshll.u32 %s206_s16, 4 }
  0x48   : > { %s1466_s20 = scalar_select %p41_p11, %s1224_s23, %s43_s1  }
  0x49   : > { %p1471_p6 = por %p180_p10, %p56_p12  ;;  %s1478_s29 = scalar_lea.hbm %s1694_s0, %s830_s9 }
  0x4a   : > { %1737 = sst [smem:[#allocation19_spill]] %s1466_s20  ;;  %p1739_p8 = scmp.lt.s32.totalorder %s1244_s28, 4 }
  0x4b   : > { %s1738_s5 = scalar_select %p1471_p6, 1, 0 }
  0x4c   : > { %p1484_p9 = pnand %p1739_p8, %p1436_p13  ;;  %s210_s13 = scalar_lea.vmem [#allocation2], %s784_s18 }
  0x4d   : > { %s217_s10 = sshll.u32 %s210_s13, 4  ;;  %s1490_s27 = scalar_lea.sflag [#allocation3], %s206_s16  ;;  %s1488_s10 = int_to_ptr.vmem [resolvable:$true] %s217_s10 }
  0x4e   : > { %s1058_s4 = scalar_lea.hbm %s1478_s29, 256  ;;  %p1060_p12 = pneg %p1484_p9 }
  0x4f   : > { %p1059_p10 = scmp.ne.s32.totalorder %s1478_s29, %s1058_s4  ;;  %s1063_s15 = scalar_lea.hbm %s1694_s0, 512 }
  0x50   : > { %p1064_p13 = scmp.lt.u32.totalorder %s1478_s29, %s1694_s0  ;;  %p1065_p11 = scmp.lt.u32.totalorder %s1063_s15, %s1058_s4 }
  0x51   : > { %p1061_p2 = pnand %p1060_p12, %p1059_p10  ;;  %p1067_p6 = scmp.lt.u32.totalorder %s1058_s4, %s1478_s29 }
  0x52   : > { %p1066_p8 = por %p1065_p11, %p1064_p13 }
  0x53   : > { %p1062_p4 = pneg %p1061_p2 }
  0x54   : > { %p1068_p3 = por %p1067_p6, %p1066_p8 }
  0x56   : > { %p1069_p0 = pnand %p1068_p3, %p1062_p4 }
  0x58   : > { %1072 = shalt.err (!%p1069_p0)
}
  0x59   : > { %s1073_s16 = scalar_lea.vmem %s1488_s10, 256  ;;  %s1250_s18 = smov [#allocation2]  }
  0x5a   : > { %p1074_p10 = scmp.ne.s32.totalorder %s1488_s10, %s1073_s16  ;;  %s1078_s13 = sshll.u32 %s1250_s18, 4  ;;  %s1079_s13 = int_to_ptr.vmem [resolvable:$false] %s1078_s13 }
  0x5b   : > { %s1080_s20 = scalar_lea.vmem %s1079_s13, 512  ;;  %p1081_p5 = scmp.lt.s32.totalorder %s1488_s10, %s1079_s13 }
  0x5c   : > { %p1076_p2 = pnand %p1074_p10, %p1060_p12  ;;  %p1082_p13 = scmp.lt.s32.totalorder %s1080_s20, %s1073_s16 }
  0x5e   : > { %p1077_p1 = pneg %p1076_p2  ;;  %p1083_p11 = por %p1082_p13, %p1081_p5 }
  0x60   : > { %p1084_p6 = pnand %p1083_p11, %p1077_p1 }
  0x62   : > { %1087 = shalt.err (!%p1084_p6)
}
  0x63   : > { %s1741_s23 = smov 4   ;;  %s1742_s4 = smov 64  }
  0x64   : > { %904 = dma.hbm_to_vmem [thread:$0]  (!%p1484_p9), %s1478_s29, 256, %s1488_s10, %s1490_s27, %s1742_s4, %s1742_s4, %s1741_s23  }
  0x65   : > { %s831_s25 = sshll.u32 %s1236_s26, 10  ;;  %s251_s9 = scalar_lea.vmem [#allocation7], %s1365_s11 }
  0x66   : > { %s258_s15 = sshll.u32 %s251_s9, 4  ;;  %s1526_s13 = scalar_lea.hbm %s1697_s3, %s831_s25  ;;  %s1528_s15 = int_to_ptr.vmem [resolvable:$true] %s258_s15 }
  0x67   : > { %s1088_s1 = scalar_lea.hbm %s1526_s13, 1024  ;;  %p1743_p1 = pneg %p1376_p7 }
  0x68   : > { %p1089_p5 = scmp.ne.s32.totalorder %s1526_s13, %s1088_s1  ;;  %s1093_s29 = scalar_lea.hbm %s1697_s3, 2048 }
  0x69   : > { %p1094_p9 = scmp.lt.u32.totalorder %s1526_s13, %s1697_s3  ;;  %p1095_p12 = scmp.lt.u32.totalorder %s1093_s29, %s1088_s1 }
  0x6a   : > { %p1091_p0 = pnand %p1089_p5, %p1743_p1  ;;  %p1097_p8 = scmp.lt.u32.totalorder %s1088_s1, %s1526_s13 }
  0x6b   : > { %p1096_p4 = por %p1095_p12, %p1094_p9 }
  0x6c   : > { %p1092_p3 = pneg %p1091_p0 }
  0x6d   : > { %p1098_p10 = por %p1097_p8, %p1096_p4 }
  0x6f   : > { %p1099_p2 = pnand %p1098_p10, %p1092_p3 }
  0x71   : > { %1102 = shalt.err (!%p1099_p2)
}
  0x72   : > { %s1103_s25 = scalar_lea.vmem %s1528_s15, 1024  ;;  %p1744_p11 = pmov %p1743_p1 }
  0x73   : > { %p1104_p13 = scmp.ne.s32.totalorder %s1528_s15, %s1103_s25  ;;  %s1251_s9 = smov [#allocation7]  }
  0x74   : > { %s1108_s18 = sshll.u32 %s1251_s9, 4  ;;  %s1109_s18 = int_to_ptr.vmem [resolvable:$false] %s1108_s18 }
  0x75   : > { %p1106_p6 = pnand %p1104_p13, %p1744_p11  ;;  %s1110_s16 = scalar_lea.vmem %s1109_s18, 2048 }
  0x76   : > { %p1111_p1 = scmp.lt.s32.totalorder %s1528_s15, %s1109_s18  ;;  %p1112_p0 = scmp.lt.s32.totalorder %s1110_s16, %s1103_s25 }
  0x77   : > { %p1107_p5 = pneg %p1106_p6 }
  0x78   : > { %p1113_p9 = por %p1112_p0, %p1111_p1 }
  0x7a   : > { %p1114_p12 = pnand %p1113_p9, %p1107_p5 }
  0x7c   : > { %1117 = shalt.err (!%p1114_p12)
}
  0x7d   : > { %910 = dma.hbm_to_vmem [thread:$0]  (!%p1376_p7), %s1526_s13, 1024, %s1528_s15, %s1383_s7, %s1742_s4, %s1742_s4, %s1741_s23  }
  0x7e   : > { %p1745_p3 = scmp.ne.s32.totalorder %s1729_s8, 0 }
  0x7f   : > { %s1560_s1 = sand.u32 (!%p1745_p3), 1, %s1220_s22   ;;  %p1746_p4 = scmp.ne.s32.totalorder (!%p1745_p3), %s1733_s30, 0 }
  0x80   : > { %270 = sbr.rel (%p1745_p3) target bundleno = 653 (0x28d), region = 40  ;;  %s793_s27 = sshll.u32 (!%p1745_p3), %s1560_s1, 4 }
  0x81   : > { %s273_s11 = scalar_lea.sflag (!%p1745_p3), [#allocation3], %s1560_s1  ;;  %s1564_s29 = scalar_lea.vmem (!%p1745_p3), [#allocation2], %s793_s27 }
  0x87   : > { %1191 = dma.done.wait (%p1746_p4), %s273_s11, 256  }
  0x88   : > { %1193 = vsyncadd (%p1746_p4), %s273_s11, 4294967040  ;;  %s281_s6 = sand.u32 1, %s1421_s12   ;;  %s283_s7 = sand.u32 1, %s1208_s19  }
  0x89   : > { %s794_s8 = sshll.u32 %s283_s7, 6  ;;  %s282_s23 = scalar_lea.sflag [#allocation6], %s281_s6 }
  0x8a   : > { %s1572_s4 = scalar_lea.vmem [#allocation5], %s794_s8  ;;  %p1747_p7 = scmp.ne.s32.totalorder %s1735_s17, 0 }
  0x8c   : > { %1195 = dma.done.wait (%p1747_p7), %s282_s23, 2048  }
  0x8d   : > { %1197 = vsyncadd (%p1747_p7), %s282_s23, 4294965248  ;;  %s796_s30 = sshll.u32 %s1560_s1, 5  ;;  %v1010_v0 = vld [vmem:[%s1572_s4] sm:$0xff]   ;;  %v1011_v1 = vld [vmem:[%s1572_s4 + $0x8] sm:$0xff]   ;;  %s1584_s12 = scalar_lea.vmem [#allocation7], %s794_s8  ;;  %v358_v18 = vlaneseq }
  0x8e   : > { %853 = vmatprep.subr.bf16.mxu0 %v1010_v0  ;;  %v1012_v2 = vld [vmem:[%s1572_s4 + $0x10] sm:$0xff]   ;;  %v1013_v3 = vld [vmem:[%s1572_s4 + $0x18] sm:$0xff]   ;;  %v1020_v5 = vld [vmem:[%s1584_s12] sm:$0xff]   ;;  %s797_s17 = sshll.u32 %s1228_s24, 1  ;;  %s1605_s20 = scalar_lea.vmem [#allocation8], %s796_s30 }
  0x8f   : > { %854 = vmatpush3.bf16.msra.mxu0 %v1010_v0  ;;  %v1018_v4 = vld [vmem:[%s1564_s29] sm:$0xff]   ;;  %v1021_v6 = vld [vmem:[%s1584_s12 + $0x8] sm:$0xff]   ;;  %873 = vmatprep.subr.bf16.mxu1 %v1020_v5  ;;  %v1023_v10 = vld [vmem:[%s1584_s12 + $0x18] sm:$0xff]   ;;  %v359_v19 = vshrl.u32 %v358_v18, 7  ;;  %s336_s10 = scalar_lea.vmem %s1696_s2, %s797_s17  ;;  %p822_p8 = scmp.ne.s32.totalorder %s1228_s24, 0 }
  0x90   : > { %855 = vmatprep.subr.bf16.mxu0 %v1011_v1  ;;  %869 = vmatprep.mubr.bf16.mxu0 %v1018_v4  ;;  %v1014_v7 = vld [vmem:[%s1572_s4 + $0x20] sm:$0xff]   ;;  %v1022_v8 = vld [vmem:[%s1584_s12 + $0x10] sm:$0xff]   ;;  %v1015_v9 = vld [vmem:[%s1572_s4 + $0x28] sm:$0xff]   ;;  %s1748_s18 = sld [smem:[#allocation21_spill]] (!%p822_p8) }
  0x91   : > { %874 = vmatpush3.bf16.msra.mxu1 %v1020_v5  ;;  %v1016_v11 = vld [vmem:[%s1572_s4 + $0x30] sm:$0xff]   ;;  %v1024_v12 = vld [vmem:[%s1584_s12 + $0x20] sm:$0xff]   ;;  %v1017_v13 = vld [vmem:[%s1572_s4 + $0x38] sm:$0xff]   ;;  %v360_v20 = vsub.s32 0, %v359_v19  ;;  %v473_v23 = vsub.s32 1, %v359_v19 }
  0x92   : > { %875 = vmatprep.subr.bf16.mxu1 %v1021_v6  ;;  %v1025_v14 = vld [vmem:[%s1584_s12 + $0x28] sm:$0xff]   ;;  %v1026_v16 = vld [vmem:[%s1584_s12 + $0x30] sm:$0xff]   ;;  %v1027_v17 = vld [vmem:[%s1584_s12 + $0x38] sm:$0xff]  }
  0x93   : > { %856 = vmatpush3.bf16.msra.mxu0 %v1011_v1  ;;  %v1019_v15 = vld [vmem:[%s1564_s29 + $0x8] sm:$0xff]   ;;  %v337_v21 = vld [vmem:[%s336_s10] sm:$0x3] }
  0x94   : > { %857 = vmatprep.subr.bf16.mxu0 %v1012_v2  ;;  %v361_v22 = vrot.slane %v337_v21, %v360_v20  ;;  %v474_v26 = vrot.slane %v337_v21, %v473_v23 }
  0x95   : > { %876 = vmatpush3.bf16.msra.mxu1 %v1021_v6 }
  0x96   : > { %877 = vmatprep.subr.bf16.mxu1 %v1022_v8  ;;  %v823_v43 = vld [vmem:[%s1748_s18] ss:$0 sm:$0xff] (!%p822_p8) }
  0x97   : > { %858 = vmatpush3.bf16.msra.mxu0 %v1012_v2 }
  0x98   : > { %859 = vmatprep.subr.bf16.mxu0 %v1013_v3 }
  0x99   : > { %878 = vmatpush3.bf16.msra.mxu1 %v1022_v8 }
  0x9a   : > { %879 = vmatprep.subr.bf16.mxu1 %v1023_v10 }
  0x9b   : > { %860 = vmatpush3.bf16.msra.mxu0 %v1013_v3 }
  0x9c   : > { %861 = vmatprep.subr.bf16.mxu0 %v1014_v7 }
  0x9d   : > { %880 = vmatpush3.bf16.msra.mxu1 %v1023_v10 }
  0x9e   : > { %881 = vmatprep.subr.bf16.mxu1 %v1024_v12 }
  0x9f   : > { %862 = vmatpush3.bf16.msra.mxu0 %v1014_v7 }
  0xa0   : > { %863 = vmatprep.subr.bf16.mxu0 %v1015_v9 }
  0xa1   : > { %882 = vmatpush3.bf16.msra.mxu1 %v1024_v12 }
  0xa2   : > { %883 = vmatprep.subr.bf16.mxu1 %v1025_v14 }
  0xa3   : > { %864 = vmatpush3.bf16.msra.mxu0 %v1015_v9 }
  0xa4   : > { %865 = vmatprep.subr.bf16.mxu0 %v1016_v11 }
  0xa5   : > { %884 = vmatpush3.bf16.msra.mxu1 %v1025_v14 }
  0xa6   : > { %885 = vmatprep.subr.bf16.mxu1 %v1026_v16 }
  0xa7   : > { %866 = vmatpush3.bf16.msra.mxu0 %v1016_v11 }
  0xa8   : > { %867 = vmatprep.subr.bf16.mxu0 %v1017_v13 }
  0xa9   : > { %886 = vmatpush3.bf16.msra.mxu1 %v1026_v16 }
  0xaa   : > { %887 = vmatprep.subr.bf16.mxu1 %v1027_v17 }
  0xab   : > { %868 = vmatpush3.bf16.msra.mxu0 %v1017_v13 }
  0xad   : > { %888 = vmatpush3.bf16.msra.mxu1 %v1027_v17 }
  0xae   : > { %870 = vmatmul.mubr.bf16.vlgmr.msra.gmra.mrb[0].mxu0 %v1019_v15 }
 0x181   : > { %v871_v24 = vpop.f32.mrb[0].mxu0 }
 0x182   : > { %v465_v25 = vadd.f32 %v871_v24, %v361_v22  ;;  %v456_v27 = vpop.f32.mrb[1].mxu0 }
 0x183   : > { %v457_v28 = vadd.f32 %v456_v27, %v361_v22  ;;  %v872_v29 = vpop.f32.mrb[2].mxu0 }
 0x184   : > { %v468_v30 = vadd.f32 %v872_v29, %v361_v22  ;;  %v459_v31 = vpop.f32.mrb[3].mxu0  ;;  %vm477_vm0 = vcmp.gt.f32.partialorder %v465_v25, %v474_v26  ;;  %v481_v33 = vmax.f32 %v465_v25, 0.0 }
 0x185   : > { %v460_v32 = vadd.f32 %v459_v31, %v361_v22  ;;  %v479_v35 = vmax.f32 %v457_v28, 0.0  ;;  %vm475_vm2 = vcmp.gt.f32.partialorder %v457_v28, %v474_v26 }
 0x186   : > { %vm478_vm1 = vcmp.gt.f32.partialorder %v468_v30, %v474_v26  ;;  %v482_v34 = vmax.f32 %v468_v30, 0.0 }
 0x187   : > { %v480_v36 = vmax.f32 %v460_v32, 0.0  ;;  %vm476_vm3 = vcmp.gt.f32.partialorder %v460_v32, %v474_v26  ;;  %vm819_vm4 = vmpackc.low %vm478_vm1, %vm477_vm0 }
 0x188   : > { %v820_v37 = vpack.c.bf16 %v482_v34, %v481_v33  ;;  %vm816_vm5 = vmpackc.low %vm476_vm3, %vm475_vm2 }
 0x189   : > { %v817_v38 = vpack.c.bf16 %v480_v36, %v479_v35 }
 0x18b   : > { %889 = vmatprep.mubr.msk.bf16.mxu1 %vm816_vm5, %v817_v38 }
 0x18c   : > { %890 = vmatmul.mubr.msk.bf16.vlgmr.msra.gmra.mrb[0].mxu1 %vm819_vm4, %v820_v37 }
 0x25c   : > { %605 = sbr.rel (%p822_p8) target bundleno = 614 (0x266), region = 56 }
 0x25f   : > { %v891_v39 = vpop.f32.mrb[0].mxu1 }
 0x260   : > { %v587_v40 = vpop.f32.mrb[1].mxu1  ;;  %v615_v46 = vadd.f32 (!%p822_p8), %v891_v39, %v823_v43 }
 0x261   : > { %v892_v41 = vpop.f32.mrb[2].mxu1  ;;  %v613_v44 = vadd.f32 (!%p822_p8), %v823_v43, %v587_v40 }
 0x262   : > { %v590_v42 = vpop.f32.mrb[3].mxu1  ;;  %v616_v47 = vadd.f32 (!%p822_p8), %v892_v41, %v823_v43  ;;  %619 = vst [vmem:[%s1605_s20 + $0x10] sm:$0xff] (!%p822_p8), %v615_v46 }
 0x263   : > { %v614_v45 = vadd.f32 %v823_v43, %v590_v42  ;;  %617 = vst [vmem:[%s1605_s20] sm:$0xff] %v613_v44 }
 0x264   : > { %620 = vst [vmem:[%s1605_s20 + $0x18] sm:$0xff] %v616_v47 }
 0x265   : > { %618 = vst [vmem:[%s1605_s20 + $0x8] sm:$0xff] %v614_v45 }
 0x266 PF: > { %p824_p10 = scmp.le.s32.totalorder %s1228_s24, 0 }
 0x268   : > { %624 = sbr.rel (%p824_p10) target bundleno = 625 (0x271), region = 60 }
 0x26b   : > { %v628_v54 = vld [vmem:[%s1605_s20 + $0x18] sm:$0xff] (!%p824_p10) }
 0x26c   : > { %v626_v49 = vld [vmem:[%s1605_s20 + $0x8] sm:$0xff] (!%p824_p10)  ;;  %v627_v50 = vld [vmem:[%s1605_s20 + $0x10] sm:$0xff] (!%p824_p10)  ;;  %v632_v55 = vadd.f32 (!%p824_p10), %v892_v41, %v628_v54 }
 0x26d   : > { %v625_v48 = vld [vmem:[%s1605_s20] sm:$0xff] (!%p824_p10)  ;;  %v630_v52 = vadd.f32 (!%p824_p10), %v626_v49, %v590_v42  ;;  %v631_v53 = vadd.f32 (!%p824_p10), %v891_v39, %v627_v50 }
 0x26e   : > { %v629_v51 = vadd.f32 (!%p824_p10), %v625_v48, %v587_v40  ;;  %636 = vst [vmem:[%s1605_s20 + $0x18] sm:$0xff] (!%p824_p10), %v632_v55 }
 0x26f   : > { %634 = vst [vmem:[%s1605_s20 + $0x8] sm:$0xff] %v630_v52  ;;  %635 = vst [vmem:[%s1605_s20 + $0x10] sm:$0xff] %v631_v53 }
 0x270   : > { %633 = vst [vmem:[%s1605_s20] sm:$0xff] %v629_v51 }
 0x271 PF: > { %s1749_s24 = sld [smem:[#allocation14_spill]]  ;;  %s651_s7 = sshll.u32 %s1605_s20, 4  ;;  %s1631_s7 = int_to_ptr.vmem [resolvable:$true] %s651_s7 }
 0x272   : > { %s1750_s29 = sld [smem:[#allocation22_spill]]  ;;  %s638_s8 = scalar_lea.sflag [#allocation4], %s1560_s1 }
 0x273   : > { %s1118_s23 = scalar_lea.vmem %s1631_s7, 512  ;;  %p1751_p13 = scmp.ne.s32.totalorder %s1736_s14, 0 }
 0x274   : > { %p1119_p2 = scmp.ne.s32.totalorder %s1631_s7, %s1118_s23  ;;  %s1252_s4 = smov [#allocation8]  }
 0x275   : > { %s1122_s30 = sshll.u32 %s1252_s4, 4  ;;  %s1123_s30 = int_to_ptr.vmem [resolvable:$false] %s1122_s30 }
 0x276   : > { %p1120_p11 = pnand %p1119_p2, %p1751_p13  ;;  %s1124_s12 = scalar_lea.vmem %s1123_s30, 1024 }
 0x277   : > { %s832_s16 = sshll.u32 %s1749_s24, 9  ;;  %p1125_p5 = scmp.lt.s32.totalorder %s1631_s7, %s1123_s30 }
 0x278   : > { %s1628_s6 = scalar_lea.hbm %s1750_s29, %s832_s16  ;;  %p1121_p6 = pneg %p1120_p11 }
 0x279   : > { %p1126_p1 = scmp.lt.s32.totalorder %s1124_s12, %s1118_s23 }
 0x27b   : > { %p1127_p0 = por %p1126_p1, %p1125_p5 }
 0x27d   : > { %p1128_p9 = pnand %p1127_p0, %p1121_p6 }
 0x27f   : > { %1131 = shalt.err (!%p1128_p9)
}
 0x280   : > { %s1132_s17 = scalar_lea.hbm %s1628_s6, 512  ;;  %s1136_s10 = scalar_lea.hbm %s1750_s29, 1024 }
 0x281   : > { %p1133_p12 = scmp.ne.s32.totalorder %s1628_s6, %s1132_s17  ;;  %p1137_p7 = scmp.lt.u32.totalorder %s1628_s6, %s1750_s29 }
 0x282   : > { %p1138_p8 = scmp.lt.u32.totalorder %s1136_s10, %s1132_s17  ;;  %p1140_p2 = scmp.lt.u32.totalorder %s1132_s17, %s1628_s6 }
 0x283   : > { %p1134_p3 = pnand %p1133_p12, %p1751_p13 }
 0x284   : > { %p1139_p10 = por %p1138_p8, %p1137_p7 }
 0x285   : > { %p1135_p4 = pneg %p1134_p3 }
 0x286   : > { %p1141_p11 = por %p1140_p2, %p1139_p10 }
 0x288   : > { %p1142_p6 = pnand %p1141_p11, %p1135_p4 }
 0x28a   : > { %1145 = shalt.err (!%p1142_p6)
}
 0x28b   : > { %s1253_s9 = smov 128   ;;  %s1254_s18 = smov 8  }
 0x28c   : > { %899 = dma.vmem_to_hbm [thread:$0]  (%p1751_p13), %s1631_s7, 512, %s1628_s6, %s638_s8, %s1253_s9, %s1253_s9, %s1254_s18  }
 0x28d PF: > { %p916_p5 = scmp.ge.s32.totalorder %s1244_s28, 2  ;;  %s666_s24 = sand.u32 1, %s1216_s21  }
 0x28e   : > { %p1752_p1 = scmp.ne.s32.totalorder %s1738_s5, 0  ;;  %s667_s16 = scalar_lea.sflag [#allocation4], %s666_s24 }
 0x290   : > { %p912_p0 = pnand %p916_p5, %p1752_p1 }
 0x292   : > { %1199 = dma.done.wait (!%p912_p0), %s667_s16, 512  }
 0x293   : > { %1201 = vsyncadd (!%p912_p0), %s667_s16, 4294966784  ;;  %s24_s28 = sadd.s32 1, %s1244_s28   ;;  %s1753_s27 = sld [smem:[#allocation12_spill]] }
 0x294   : > { %p21_p9 = scmp.ge.s32.totalorder %s24_s28, 6   ;;  %s1754_s20 = sld [smem:[#allocation17_spill]] }
 0x295   : > { %s1755_s14 = sld [smem:[#allocation13_spill]]  ;;  %s1756_s23 = sld [smem:[#allocation19_spill]] }
 0x296   : > { %s1757_s25 = sld [smem:[#allocation15_spill]]  ;;  %s1758_s1 = sld [smem:[#allocation16_spill]] }
 0x297   : > { %s1759_s11 = sld [smem:[#allocation18_spill]]  ;;  %s1760_s18 = smov %s1208_s19 }
 0x298   : > { %s1762_s21 = smov %s1220_s22  ;;  %s1764_s24 = smov %s1236_s26 }
 0x299   : > { %s1761_s19 = smov %s1753_s27  ;;  %23 = sbr.rel (!%p21_p9) target bundleno = 15 (0xf), region = 118 }
 0x29b   : > { %s1763_s22 = smov %s1755_s14 }
 0x29c   : > { %s1765_s26 = smov %s1758_s1 }
 0x29d   : > { %s1766_s27 = smov %s1759_s11 }
 0x2a0   :  { %672 = vsyncpa [#allocation3], 1 }
 0x2a1   :  { %674 = vsyncpa [#allocation3 + $0x1], 1 }
 0x2a2   :  { %675 = vsyncpa [#allocation6], 1 }
 0x2a3   :  { %677 = vsyncpa [#allocation6 + $0x1], 1 }
 0x2a4   :  { %678 = vsyncpa [#allocation4], 1 }
 0x2a5   :  { %680 = vsyncpa [#allocation4 + $0x1], 1 }

</bundles_post_ra>
